<compile_context>
chip_gen: v7x
topology: tpu7x:2x2x1
jax: 0.10.0
libtpu: 0.0.40
codegen_flags: <defaults>
</compile_context>

<pallas_src>
import functools

import jax
import jax.numpy as jnp
from jax.experimental import pallas as pl
from jax.experimental.pallas import tpu as pltpu


def _label_smoothing_kernel(pred_ref, tgt_ref, out_ref, *,
                            confidence, smooth_val, n_rows, block_rows, n_steps):
    """One grid step: reduce a (block_rows, C) tile of logits to a partial sum.

    Per-row loss (weights sum to 1, so the lse terms fold to exactly 1*lse):
        loss_row = logsumexp(x) - sum_c w[c] * x[c]
        w[c]     = confidence if c == target else smooth_val
    The running total lives in the resident (1, 1) output block; the mean is
    written on the last grid step.
    """
    i = pl.program_id(0)

    @pl.when(i == 0)
    def _init():
        out_ref[...] = jnp.zeros_like(out_ref)

    x = pred_ref[...].astype(jnp.float32)                         # (TB, C)
    tgt = tgt_ref[...]                                            # (TB, 1) int32

    # Numerically stable logsumexp per row: one max pass, then one fused pass
    # over the same vregs doing the exp-sum and the weighted-sum.
    m = jnp.max(x, axis=-1, keepdims=True)                        # (TB, 1)
    lse = m + jnp.log(jnp.sum(jnp.exp(x - m), axis=-1, keepdims=True))

    cls_idx = jax.lax.broadcasted_iota(jnp.int32, x.shape, 1)     # (TB, C)
    w = jnp.where(cls_idx == tgt, confidence, smooth_val)         # (TB, C)
    wx = jnp.sum(w * x, axis=-1, keepdims=True)                   # (TB, 1)

    per_row = lse - wx                                            # (TB, 1)

    # Mask rows that belong to the padded tail tile (grid = cdiv(N, block_rows)).
    row_idx = i * block_rows + jax.lax.broadcasted_iota(
        jnp.int32, per_row.shape, 0)
    per_row = jnp.where(row_idx < n_rows, per_row, 0.0)

    # Accumulate the tile's partial sum into the resident (1, 1) output block.
    out_ref[...] = out_ref[...] + jnp.sum(per_row, keepdims=True)

    @pl.when(i == n_steps - 1)
    def _finalize():
        out_ref[...] = out_ref[...] * (1.0 / float(n_rows))


def _round_up(x, m):
    return ((x + m - 1) // m) * m


def _vmem_capacity_bytes():
    try:
        return int(pltpu.get_tpu_info().vmem_capacity_bytes)
    except Exception:
        return 64 << 20  # conservative: v7x per-TensorCore VMEM


def _pick_block_rows(n_rows, n_cols, itemsize, vmem_limit_bytes):
    """Largest row tile (multiple of the dtype's sublane quantum) whose
    double-buffered pred + target blocks fit ~2/3 of the VMEM limit."""
    sublane = {4: 8, 2: 16, 1: 32}.get(itemsize, 8)
    # Per-row VMEM cost, double-buffered by the pipeline:
    #   pred row (n_cols * itemsize) + (8,128)-lane-padded int32 target row (512 B).
    row_bytes = 2 * (n_cols * itemsize + 128 * 4)
    budget = max(1 << 20, (2 * vmem_limit_bytes) // 3)
    br = budget // row_bytes
    br = min(br, 2048, _round_up(n_rows, sublane))
    br = max(sublane, (br // sublane) * sublane)
    return int(br)


def label_smoothing_loss_pallas(pred, target, classes, smoothing=0.1,
                                block_rows=None):
    """pred: (N, C) float, target: (N,) int -> scalar mean loss (Pallas path)."""
    N, C = pred.shape
    assert C == classes

    itemsize = jnp.dtype(pred.dtype).itemsize
    vmem_limit = int(_vmem_capacity_bytes() * 3 // 4)   # 48 MiB v7x, 96 MiB v5e/v6e
    if block_rows is None:
        block_rows = _pick_block_rows(N, C, itemsize, vmem_limit)
    n_steps = int(pl.cdiv(N, block_rows))

    # Plain Python scalars -> compile-time constants inside the kernel.
    confidence = 1.0 - smoothing
    smooth_val = smoothing / (classes - 1)

    tgt2d = target.astype(jnp.int32).reshape(N, 1)

    kernel = functools.partial(
        _label_smoothing_kernel,
        confidence=float(confidence),
        smooth_val=float(smooth_val),
        n_rows=int(N),
        block_rows=int(block_rows),
        n_steps=n_steps,
    )

    out = pl.pallas_call(
        kernel,
        out_shape=jax.ShapeDtypeStruct((1, 1), jnp.float32),
        grid_spec=pltpu.PrefetchScalarGridSpec(
            num_scalar_prefetch=0,
            grid=(n_steps,),
            in_specs=[
                # pred: streamed (block_rows, C) tiles, classes on the lane axis.
                pl.BlockSpec((block_rows, C), lambda i: (i, 0)),
                # target: per-tile block riding the same pipeline (not resident).
                pl.BlockSpec((block_rows, 1), lambda i: (i, 0)),
            ],
            # (1, 1) output block, constant index -> resident accumulator,
            # single 4-byte HBM writeback at the end of the grid.
            out_specs=pl.BlockSpec((1, 1), lambda i: (0, 0)),
        ),
        compiler_params=pltpu.CompilerParams(
            # The output block is revisited every step (reduction axis).
            dimension_semantics=("arbitrary",),
            vmem_limit_bytes=vmem_limit,
        ),
    )(pred, tgt2d)

    return out[0, 0]


def label_smoothing_loss_xla(pred, target, classes, smoothing=0.1):
    """Fused-XLA path (also the correctness reference)."""
    logp = jax.nn.log_softmax(pred.astype(jnp.float32), axis=-1)
    smooth_val = smoothing / (classes - 1)
    confidence = 1.0 - smoothing
    true_dist = jnp.full_like(logp, smooth_val)
    true_dist = true_dist.at[jnp.arange(pred.shape[0]), target].set(confidence)
    return jnp.mean(jnp.sum(-true_dist * logp, axis=-1))


def label_smoothing_loss(pred, target, classes, smoothing=0.1, use_pallas=None):
    """Dispatch: Pallas kernel for large (vocab-sized) problems, XLA otherwise."""
    N, C = pred.shape
    if use_pallas is None:
        use_pallas = (C >= 128) and (N * C >= (1 << 18))
    if use_pallas:
        return label_smoothing_loss_pallas(pred, target, classes, smoothing)
    return label_smoothing_loss_xla(pred, target, classes, smoothing)


if __name__ == "__main__":
    key = jax.random.PRNGKey(0)
    k1, k2 = jax.random.split(key)

    N, C = 16, 32          # batch=16, classes=32
    smoothing = 0.1

    pred = jax.random.normal(k1, (N, C), dtype=jnp.float32)
    target = jax.random.randint(k2, (N,), 0, C, dtype=jnp.int32)

    # Force the Pallas path so the kernel itself is exercised at this small size.
    loss = label_smoothing_loss(pred, target, classes=C, smoothing=smoothing,
                                use_pallas=True)
    loss = jax.block_until_ready(loss)

    ref = label_smoothing_loss_xla(pred, target, classes=C, smoothing=smoothing)
    assert jnp.allclose(loss, ref, atol=1e-5, rtol=1e-5), (loss, ref)

    print("KERNEL_OK")
</pallas_src>

<mosaic_0001>
module attributes {stable_mosaic.version = 11 : i64} {
  func.func @_label_smoothing_kernel(%arg0: i32, %arg1: memref<16x32xf32, #tpu.memory_space<vmem>>, %arg2: memref<16x1xi32, #tpu.memory_space<vmem>>, %arg3: memref<1x1xf32, #tpu.memory_space<vmem>>) attributes {dimension_semantics = [#tpu.dimension_semantics<arbitrary>], iteration_bounds = array<i64: 1>, scalar_prefetch = 0 : i64, scratch_operands = 0 : i64, tpu.core_type = #tpu.core_type<tc>, window_params = [{transform_indices = @transform_0, window_bounds = array<i64: 16, 32>}, {transform_indices = @transform_1, window_bounds = array<i64: 16, 1>}, {pipeline_mode = #tpu.pipeline_mode<synchronous>, transform_indices = @transform_2, window_bounds = array<i64: 1, 1>}]} {
    %c0_i32 = arith.constant 0 : i32
    %0 = arith.cmpi eq, %arg0, %c0_i32 : i32
    %1 = arith.extui %0 : i1 to i32
    %c0_i32_0 = arith.constant 0 : i32
    %2 = arith.cmpi ne, %1, %c0_i32_0 : i32
    scf.if %2 {
      %cst_17 = arith.constant 0.000000e+00 : f32
      %43 = vector.broadcast %cst_17 : f32 to vector<1x1xf32>
      %c0_18 = arith.constant 0 : index
      %c0_19 = arith.constant 0 : index
      %44 = vector.load %arg3[%c0_18, %c0_19] : memref<1x1xf32, #tpu.memory_space<vmem>>, vector<1x1xf32>
      tpu.vector_store %arg3[%c0_18, %c0_19], %43 {strides = array<i32>} : memref<1x1xf32, #tpu.memory_space<vmem>>, vector<1x1xf32>,
    } else {
    }
    %c0 = arith.constant 0 : index
    %c0_1 = arith.constant 0 : index
    %3 = vector.load %arg1[%c0, %c0_1] : memref<16x32xf32, #tpu.memory_space<vmem>>, vector<16x32xf32>
    %c0_2 = arith.constant 0 : index
    %c0_3 = arith.constant 0 : index
    %4 = vector.load %arg2[%c0_2, %c0_3] : memref<16x1xi32, #tpu.memory_space<vmem>>, vector<16x1xi32>
    %cst = arith.constant dense<0xFF800000> : vector<16xf32>
    %5 = vector.multi_reduction <maximumf>, %3, %cst [1] : vector<16x32xf32> to vector<16xf32>
    %6 = vector.shape_cast %5 : vector<16xf32> to vector<16x1xf32>
    %7 = vector.broadcast %6 : vector<16x1xf32> to vector<16x32xf32>
    %8 = arith.subf %3, %7 : vector<16x32xf32>
    %9 = math.exp %8 : vector<16x32xf32>
    %cst_4 = arith.constant dense<0.000000e+00> : vector<16xf32>
    %10 = vector.multi_reduction <add>, %9, %cst_4 [1] : vector<16x32xf32> to vector<16xf32>
    %11 = vector.shape_cast %10 : vector<16xf32> to vector<16x1xf32>
    %12 = math.log %11 : vector<16x1xf32>
    %13 = arith.addf %6, %12 : vector<16x1xf32>
    %14 = tpu.iota {dimensions = array<i32: 1>} : vector<16x32xi32>
    %15 = vector.broadcast %4 : vector<16x1xi32> to vector<16x32xi32>
    %16 = arith.cmpi eq, %14, %15 : vector<16x32xi32>
    %cst_5 = arith.constant 0.899999976 : f32
    %cst_6 = arith.constant 0.0032258064 : f32
    %17 = vector.broadcast %cst_5 : f32 to vector<16x32xf32>
    %18 = vector.broadcast %cst_6 : f32 to vector<16x32xf32>
    %19 = arith.select %16, %17, %18 : vector<16x32xi1>, vector<16x32xf32>
    %20 = arith.mulf %19, %3 : vector<16x32xf32>
    %cst_7 = arith.constant dense<0.000000e+00> : vector<16xf32>
    %21 = vector.multi_reduction <add>, %20, %cst_7 [1] : vector<16x32xf32> to vector<16xf32>
    %22 = vector.shape_cast %21 : vector<16xf32> to vector<16x1xf32>
    %23 = arith.subf %13, %22 : vector<16x1xf32>
    %c16_i32 = arith.constant 16 : i32
    %24 = arith.muli %arg0, %c16_i32 : i32
    %25 = tpu.iota {dimensions = array<i32: 0>} : vector<16x1xi32>
    %26 = vector.broadcast %24 : i32 to vector<16x1xi32>
    %27 = arith.addi %26, %25 : vector<16x1xi32>
    %c16_i32_8 = arith.constant 16 : i32
    %28 = vector.broadcast %c16_i32_8 : i32 to vector<16x1xi32>
    %29 = arith.cmpi slt, %27, %28 : vector<16x1xi32>
    %cst_9 = arith.constant 0.000000e+00 : f32
    %30 = vector.broadcast %cst_9 : f32 to vector<16x1xf32>
    %31 = arith.select %29, %23, %30 : vector<16x1xi1>, vector<16x1xf32>
    %c0_10 = arith.constant 0 : index
    %c0_11 = arith.constant 0 : index
    %32 = vector.load %arg3[%c0_10, %c0_11] : memref<1x1xf32, #tpu.memory_space<vmem>>, vector<1x1xf32>
    %33 = vector.shape_cast %31 : vector<16x1xf32> to vector<1x16x1xf32>
    %cst_12 = arith.constant dense<0.000000e+00> : vector<1xf32>
    %34 = vector.multi_reduction <add>, %33, %cst_12 [1, 2] : vector<1x16x1xf32> to vector<1xf32>
    %35 = vector.shape_cast %34 : vector<1xf32> to vector<1x1x1xf32>
    %36 = vector.extract %35[0, 0, 0] : f32 from vector<1x1x1xf32>
    %37 = vector.broadcast %36 : f32 to vector<1x1xf32>
    %38 = arith.addf %32, %37 : vector<1x1xf32>
    %c0_13 = arith.constant 0 : index
    %c0_14 = arith.constant 0 : index
    %39 = vector.load %arg3[%c0_13, %c0_14] : memref<1x1xf32, #tpu.memory_space<vmem>>, vector<1x1xf32>
    tpu.vector_store %arg3[%c0_13, %c0_14], %38 {strides = array<i32>} : memref<1x1xf32, #tpu.memory_space<vmem>>, vector<1x1xf32>,
    %c0_i32_15 = arith.constant 0 : i32
    %40 = arith.cmpi eq, %arg0, %c0_i32_15 : i32
    %41 = arith.extui %40 : i1 to i32
    %c0_i32_16 = arith.constant 0 : i32
    %42 = arith.cmpi ne, %41, %c0_i32_16 : i32
    scf.if %42 {
      %c0_17 = arith.constant 0 : index
      %c0_18 = arith.constant 0 : index
      %43 = vector.load %arg3[%c0_17, %c0_18] : memref<1x1xf32, #tpu.memory_space<vmem>>, vector<1x1xf32>
      %cst_19 = arith.constant 6.250000e-02 : f32
      %44 = vector.broadcast %cst_19 : f32 to vector<1x1xf32>
      %45 = arith.mulf %43, %44 : vector<1x1xf32>
      %c0_20 = arith.constant 0 : index
      %c0_21 = arith.constant 0 : index
      %46 = vector.load %arg3[%c0_20, %c0_21] : memref<1x1xf32, #tpu.memory_space<vmem>>, vector<1x1xf32>
      tpu.vector_store %arg3[%c0_20, %c0_21], %45 {strides = array<i32>} : memref<1x1xf32, #tpu.memory_space<vmem>>, vector<1x1xf32>,
    } else {
    }
    return
  }
  func.func @transform_0(%arg0: i32) -> (i32, i32) {
    %c0_i32 = arith.constant 0 : i32
    %c0_i32_0 = arith.constant 0 : i32
    return %arg0, %c0_i32 : i32, i32
  }
  func.func @transform_1(%arg0: i32) -> (i32, i32) {
    %c0_i32 = arith.constant 0 : i32
    %c0_i32_0 = arith.constant 0 : i32
    return %arg0, %c0_i32 : i32, i32
  }
  func.func @transform_2(%arg0: i32) -> (i32, i32) {
    %c0_i32 = arith.constant 0 : i32
    %c0_i32_0 = arith.constant 0 : i32
    %c0_i32_1 = arith.constant 0 : i32
    return %c0_i32, %c0_i32_0 : i32, i32
  }
}

</mosaic_0001>

<bundles_post_ra>
// kernel: tpu_custom_call.1
= control target key start
LH: loop header
LB: loop body
LE: loop exit
PB: predicated region body
PF: predicated region fallthrough
CT: control target
= control target key end

     0   :  { %vm22_vm0 = vcmask 261120   ;;  %v158_v4 = vmov 0   ;;  %s210_s0 = inlined_call_operand.vmem [shape: f32[16,32], index: 0, kind: input, shape index: {}]   ;;  %s211_s1 = inlined_call_operand.vmem [shape: s32[16,1], index: 1, kind: input, shape index: {}]   ;;  %s212_s2 = inlined_call_operand.hbm [shape: f32[1,1], index: 2, kind: output, shape index: {}]  }
   0x1   :  { %v18_v0 = vld [vmem:[%s210_s0] sm:$0xff]  ;;  %v19_v1 = vld [vmem:[%s210_s0 + $0x8] sm:$0xff]  ;;  %124 = vset.pattern.permute.xlu1 %v158_v4  ;;  %125 = vset.pattern.permute.xlu0 %v158_v4 }
   0x2   :  { %v20_v2 = vld [vmem:[%s211_s1] sm:$0xff]  ;;  %v23_v3 = vsel %vm22_vm0, %v18_v0, -inf }
   0x3   :  { %7 = vsyncpa [#allocation3], 0  ;;  %24 = vmax.xlane.f32.xlu0 %v23_v3  ;;  %50 = vperm.xlu1 %124, %v20_v2   ;;  %v26_v5 = vsel %vm22_vm0, %v19_v1, -inf  ;;  %v21_v6 = vld [vmem:[%s211_s1 + $0x8] sm:$0xff]  ;;  %v47_v8 = vlaneseq  ;;  %v159_v17 = vmov 0.0032258064  }
   0x4   :  { %vm81_vm3 = vcmask 7168   ;;  %vm16_vm4 = vcmask 0   ;;  %v160_v43 = vmov 0.0   ;;  %s161_s1 = smov [#allocation2]  }
   0x5   :  { %v48_v13 = vand.u32 127, %v47_v8  ;;  %17 = vst.msk [vmem:[#allocation2] sm:$0x1] %vm16_vm4, %v160_v43  ;;  %s110_s17 = sshll.u32 %s161_s1, 4  ;;  %s111_s17 = int_to_ptr.vmem [resolvable:$true] %s110_s17 }
   0x6   :  { %s134_s18 = scalar_lea.vmem %s111_s17, 16  ;;  %s138_s19 = scalar_lea.vmem %s111_s17, 32 }
   0x7   :  { %27 = vmax.xlane.f32.xlu0 %v26_v5  ;;  %53 = vperm.xlu1 %124, %v21_v6   ;;  %p135_p0 = scmp.ne.s32.totalorder %s111_s17, %s134_s18  ;;  %p139_p1 = scmp.lt.s32.totalorder %s111_s17, %s111_s17 }
   0x8   :  { %p140_p2 = scmp.lt.s32.totalorder %s138_s19, %s134_s18 }
   0xa   :  { %p141_p3 = por %p140_p2, %p139_p1 }
   0xc   :  { %v80_v51 = vld [vmem:[#allocation2] sm:$0x1]  ;;  %p142_p4 = pnand %p141_p3, %p135_p0 }
  0x82   :  { %v51_v11 = vpop.permute.xlu1 %50 }
  0x83   :  { %vm55_vm1 = vcmp.eq.s32.totalorder %v48_v13, %v51_v11 }
  0x84   :  { %v57_v18 = vsel %vm55_vm1, 0.9, %v159_v17 }
  0x85   :  { %v59_v19 = vmul.f32 %v57_v18, %v18_v0 }
  0x86   :  { %v54_v16 = vpop.permute.xlu1 %53 }
  0x87   :  { %vm56_vm2 = vcmp.eq.s32.totalorder %v48_v13, %v54_v16  ;;  %v61_v23 = vsel %vm22_vm0, %v59_v19, 0.0 }
  0x88   :  { %v58_v21 = vsel %vm56_vm2, 0.9, %v159_v17 }
  0x89   :  { %v60_v24 = vmul.f32 %v58_v21, %v19_v1 }
  0x8b   :  { %v64_v27 = vsel %vm22_vm0, %v60_v24, 0.0 }
  0x90   :  { %v25_v7 = vpop.xlane.xlu0 %24 }
  0x91   :  { %v29_v9 = vsub.f32 %v18_v0, %v25_v7 }
  0x93   :  { %v31_v10 = vmul.f32 1.442695, %v29_v9 }
  0x94   :  { %v28_v12 = vpop.xlane.xlu0 %27 }
  0x95   :  { %126 = vpow2.f32 %v31_v10  ;;  %v30_v14 = vsub.f32 %v19_v1, %v28_v12 }
  0x97   :  { %v33_v15 = vmul.f32 1.442695, %v30_v14 }
  0x99   :  { %128 = vpow2.f32 %v33_v15 }
  0x9f   :  { %v127_v20 = vpop.eup %126 }
  0xa0   :  { %v35_v22 = vsel %vm22_vm0, %v127_v20, 0.0 }
  0xa1   :  { %36 = vadd.xlane.f32.xlu0 %v35_v22 }
  0xa3   :  { %v129_v25 = vpop.eup %128 }
  0xa4   :  { %v38_v26 = vsel %vm22_vm0, %v129_v25, 0.0 }
  0xa5   :  { %39 = vadd.xlane.f32.xlu1 %v38_v26  ;;  %62 = vadd.xlane.f32.xlu0 %v61_v23 }
  0xa9   :  { %65 = vadd.xlane.f32.xlu0 %v64_v27 }
 0x12e   :  { %v37_v28 = vpop.xlane.xlu0 %36 }
 0x12f   :  { %130 = vlog2.f32 %v37_v28 }
 0x132   :  { %v40_v29 = vpop.xlane.xlu1 %39  ;;  %v63_v32 = vpop.xlane.xlu0 %62 }
 0x133   :  { %132 = vlog2.f32 %v40_v29 }
 0x136   :  { %v66_v38 = vpop.xlane.xlu0 %65 }
 0x139   :  { %v131_v30 = vpop.eup %130 }
 0x13a   :  { %v42_v31 = vmul.f32 0.6931472, %v131_v30 }
 0x13c   :  { %v45_v33 = vadd.f32 %v42_v31, %v25_v7 }
 0x13d   :  { %v133_v34 = vpop.eup %132 }
 0x13e   :  { %v44_v35 = vmul.f32 0.6931472, %v133_v34  ;;  %v67_v36 = vsub.f32 %v45_v33, %v63_v32 }
 0x140   :  { %v46_v37 = vadd.f32 %v44_v35, %v28_v12  ;;  %v82_v40 = vsel %vm81_vm3, %v67_v36, 0.0 }
 0x142   :  { %v68_v39 = vsub.f32 %v46_v37, %v66_v38 }
 0x144   :  { %v83_v41 = vsel %vm81_vm3, %v68_v39, 0.0 }
 0x145   :  { %v84_v42 = vadd.f32 %v83_v41, %v82_v40 }
 0x147   :  { %85 = vadd.xlane.f32.xlu0 %v84_v42 }
 0x1d4   :  { %v86_v44 = vpop.xlane.xlu0 %85 }
 0x1d5   :  { %v87_v45 = vrot.slane %v86_v44, 4 }
 0x1d7   :  { %v88_v46 = vadd.f32 %v87_v45, %v86_v44 }
 0x1d9   :  { %v89_v47 = vrot.slane %v88_v46, 2 }
 0x1db   :  { %v90_v48 = vadd.f32 %v89_v47, %v88_v46 }
 0x1dd   :  { %v91_v49 = vrot.slane %v90_v48, 1 }
 0x1df   :  { %v92_v50 = vadd.f32 %v91_v49, %v90_v48 }
 0x1e1   :  { %118 = vpush %v92_v50 }
 0x212   :  { %s119_s0 = spop %118 }
 0x213   :  { %v94_v52 = vstv %s119_s0 }
 0x214   :  { %v95_v53 = vadd.f32 %v94_v52, %v80_v51 }
 0x216   :  { %97 = vst.msk [vmem:[#allocation2] sm:$0x1] %vm16_vm4, %v95_v53 }
 0x21d   :  { %v101_v54 = vld [vmem:[#allocation2] sm:$0x1] }
 0x21e   :  { %v102_v55 = vmul.f32 0.0625, %v101_v54 }
 0x220   :  { %103 = vst.msk [vmem:[#allocation2] sm:$0x1] %vm16_vm4, %v102_v55 }
 0x221   :  { %145 = shalt.err (!%p142_p4)
}
 0x222   :  { %s146_s22 = scalar_lea.hbm %s212_s2, 16 }
 0x223   :  { %p147_p5 = scmp.ne.s32.totalorder %s212_s2, %s146_s22  ;;  %p150_p6 = scmp.lt.u32.totalorder %s146_s22, %s212_s2 }
 0x225   :  { %p152_p7 = pnand %p150_p6, %p147_p5 }
 0x227   :  { %155 = shalt.err (!%p152_p7)
}
 0x228   :  { %113 = dma.vmem_to_hbm [thread:$0]  %s111_s17, 16, %s212_s2, [#allocation3]  }
 0x229   :  { %156 = dma.done.wait [#allocation3], 16  }
 0x22a   :  { %157 = vsyncadd [#allocation3], 4294967280 }
 0x22b   :  { %117 = vsyncpa [#allocation3], 1 }

</bundles_post_ra>
